<compile_context>
chip_gen: v7x
topology: tpu7x:2x2x1
jax: 0.10.0
libtpu: 0.0.40
codegen_flags: <defaults>
</compile_context>

<pallas_src>
import functools

import jax
import jax.numpy as jnp
from jax.experimental import pallas as pl
from jax.experimental.pallas import tpu as pltpu


def _sublane_min(dtype) -> int:
    # f32/i32 -> 8, bf16/f16 -> 16, int8/fp8 -> 32 (sublane packing minimum).
    return max(8, 32 // jnp.dtype(dtype).itemsize)


def _ceil_to(x: int, m: int) -> int:
    return pl.cdiv(x, m) * m


@functools.lru_cache(maxsize=None)
def _chip_profile():
    """Returns (per-block VMEM budget, vmem_limit_bytes or None, preferred steps).

    Bigger blocks amortize the ~0.35 us/grid-step overhead on v7x's 3.2 TB/s
    HBM (double-buffered in+out still fits its 64 MiB VMEM, with an explicit
    vmem_limit), while v5e stays at 2 MiB blocks to respect its 16 MiB
    scoped-VMEM default.  prefer_steps > 1 asks for an even grid with >= 4
    steps so both v7x TensorCores stay busy with pipelined work; it is 1 on
    single-TensorCore chips (v5e/v6e) where shrinking blocks only adds
    per-step overhead.
    """
    kind = ""
    try:
        kind = (getattr(jax.devices()[0], "device_kind", "") or "").lower()
    except Exception:
        pass
    if "v7" in kind:                                     # v7x: 2 TCs, 64 MiB VMEM
        return 6 * 1024 * 1024, 48 * 1024 * 1024, 4
    if "v6" in kind:                                     # v6e: 32 MiB scoped default
        return 4 * 1024 * 1024, None, 1
    if "v5 lite" in kind or "v5e" in kind or "v5lite" in kind:   # v5e: 16 MiB default
        return 2 * 1024 * 1024, None, 1
    return 2 * 1024 * 1024, None, 1                      # conservative default


def _pick_tile(extent: int, bytes_per_unit: int, unit: int,
               budget: int, prefer_steps: int) -> int:
    """Tile size along one dim: a multiple of `unit`, or the full `extent`.

    Largest size that fits `budget`, preferring an even grid of at least
    `prefer_steps` steps (v7x megacore).  Partial last blocks are fine —
    Pallas masks out-of-bounds writes on edge blocks — so `extent` need not
    divide evenly.
    """
    max_t = (budget // max(bytes_per_unit, 1)) // unit * unit
    if max_t < unit:
        max_t = unit                       # budget is soft; never below one tile unit
    if prefer_steps <= 1 and extent <= max_t:
        return extent                      # single block == full extent (always legal)
    steps = max(pl.cdiv(extent, max_t), prefer_steps)
    if prefer_steps > 1 and steps % 2:
        steps += 1                         # even split across the two v7x TensorCores
    t = pl.cdiv(pl.cdiv(extent, steps), unit) * unit
    t = min(max(t, unit), max_t)
    if t >= extent:
        return extent
    return t


def _scaled_sigmoid_kernel(w_ref, b_ref, x_ref, o_ref):
    # w_ref/b_ref: SMEM scalars (shape (1,)); x_ref/o_ref: VMEM tiles (any rank).
    # Purely elementwise -> HBM-bandwidth bound; sigmoid lowers to the EUP.
    o_ref[...] = jax.nn.sigmoid(x_ref[...] * w_ref[0] + b_ref[0]).astype(o_ref.dtype)


def _call_elementwise(x_view, w, b, budget, vmem_limit, prefer_steps):
    """pallas_call of sigmoid(x*w+b) on a 1-D / 2-D / 3-D layout-preserving view."""
    dtype = x_view.dtype
    itemsize = jnp.dtype(dtype).itemsize
    sub = _sublane_min(dtype)
    n = x_view.size
    cost = pl.CostEstimate(flops=2 * n, transcendentals=n,
                           bytes_accessed=2 * n * itemsize)

    if x_view.ndim == 1:
        (length,) = x_view.shape
        gran = sub * 128                              # lane-tile granule for 1-D blocks
        blk = _pick_tile(length, itemsize, gran, budget, prefer_steps)
        grid = (pl.cdiv(length, blk),)
        x_spec = pl.BlockSpec((blk,), lambda i: (i,))
        o_spec = pl.BlockSpec((blk,), lambda i: (i,))
        sem = ("parallel",)
    elif x_view.ndim == 2:
        rows, lanes = x_view.shape
        tr = _pick_tile(rows, _ceil_to(lanes, 128) * itemsize, sub, budget,
                        prefer_steps)
        grid = (pl.cdiv(rows, tr),)
        x_spec = pl.BlockSpec((tr, lanes), lambda i: (i, 0))
        o_spec = pl.BlockSpec((tr, lanes), lambda i: (i, 0))
        sem = ("parallel",)
    else:  # 3-D (leading, H, W) view — trailing dims kept full (no (8,128) constraint)
        lead, hh, ww = x_view.shape
        lane_bytes = _ceil_to(ww, 128) * itemsize
        slab_bytes = _ceil_to(hh, sub) * lane_bytes
        if slab_bytes <= budget:
            th = hh
            bt = _pick_tile(lead, slab_bytes, 1, budget, prefer_steps)
        else:                                         # a single (H, W) slab exceeds budget
            bt = 1
            th = _pick_tile(hh, lane_bytes, sub, budget, prefer_steps)
        grid = (pl.cdiv(lead, bt), pl.cdiv(hh, th))
        x_spec = pl.BlockSpec((bt, th, ww), lambda i, j: (i, j, 0))
        o_spec = pl.BlockSpec((bt, th, ww), lambda i, j: (i, j, 0))
        sem = ("parallel", "parallel")

    return pl.pallas_call(
        _scaled_sigmoid_kernel,
        out_shape=jax.ShapeDtypeStruct(x_view.shape, dtype),
        grid=grid,
        in_specs=[pl.BlockSpec(memory_space=pltpu.SMEM),   # W (scalar)
                  pl.BlockSpec(memory_space=pltpu.SMEM),   # B (scalar)
                  x_spec],
        out_specs=o_spec,
        compiler_params=pltpu.CompilerParams(
            dimension_semantics=sem, vmem_limit_bytes=vmem_limit),
        cost_estimate=cost,
    )(w, b, x_view)


def pallas_scaled_sigmoid(x: jax.Array, w: jax.Array, b: jax.Array) -> jax.Array:
    """Elementwise sigmoid(x * w + b) on a layout-preserving (bitcast-only) view."""
    budget, vmem_limit, prefer_steps = _chip_profile()
    w = jnp.reshape(jnp.asarray(w), (1,))
    b = jnp.reshape(jnp.asarray(b), (1,))
    orig_shape = x.shape
    sub = _sublane_min(x.dtype)

    if x.ndim == 0:
        view = x.reshape(1, 1)
    elif x.ndim <= 2:
        view = x
    else:
        hh, ww = x.shape[-2], x.shape[-1]
        lead = x.size // max(hh * ww, 1)
        if ww % 128 == 0 and hh % sub == 0:
            # Collapsing into the sublane dim is also a bitcast here -> widest
            # lane-dense 2-D view (unmasked stores, largest row tiles).
            view = x.reshape(lead * hh, ww)
        else:
            view = x.reshape(lead, hh, ww)   # collapse leading dims only (bitcast)

    out = _call_elementwise(view, w, b, budget, vmem_limit, prefer_steps)
    return out.reshape(orig_shape)


def pallas_scaled_sigmoid_last_depth(x5: jax.Array, w: jax.Array,
                                     b: jax.Array) -> jax.Array:
    """sigmoid(x5[:, :, -1] * w + b) -> (B, C, 1, H, W).

    The depth slice is folded into the input BlockSpec: a (bt, 1, th, W) block
    at depth-block index depth-1 on a bitcast (B*C, depth, H, W) view, so only
    the last depth slab is ever read from HBM (works for any H/W since the two
    trailing block dims equal the full array dims).
    """
    budget, vmem_limit, prefer_steps = _chip_profile()
    w = jnp.reshape(jnp.asarray(w), (1,))
    b = jnp.reshape(jnp.asarray(b), (1,))
    bsz, ch, depth, hh, ww = x5.shape
    dtype = x5.dtype
    itemsize = jnp.dtype(dtype).itemsize
    sub = _sublane_min(dtype)
    lead = bsz * ch

    x4 = x5.reshape(lead, depth, hh, ww)      # collapse leading dims only: bitcast

    lane_bytes = _ceil_to(ww, 128) * itemsize
    slab_bytes = _ceil_to(hh, sub) * lane_bytes
    # Per-leading-index DMA segments are whole padded (th, ww) slabs (>= ~4 KiB),
    # so the strided depth-slice read stays bandwidth-bound, not descriptor-bound.
    if slab_bytes <= budget:
        th = hh
        bt = _pick_tile(lead, slab_bytes, 1, budget, prefer_steps)
    else:
        bt = 1
        th = _pick_tile(hh, lane_bytes, sub, budget, prefer_steps)
    grid = (pl.cdiv(lead, bt), pl.cdiv(hh, th))

    n_out = lead * hh * ww
    out = pl.pallas_call(
        _scaled_sigmoid_kernel,
        out_shape=jax.ShapeDtypeStruct((lead, 1, hh, ww), dtype),
        grid=grid,
        in_specs=[
            pl.BlockSpec(memory_space=pltpu.SMEM),                         # W
            pl.BlockSpec(memory_space=pltpu.SMEM),                         # B
            # depth-block index (depth - 1) selects X[:, :, -1] straight from HBM
            pl.BlockSpec((bt, 1, th, ww), lambda i, j: (i, depth - 1, j, 0)),
        ],
        out_specs=pl.BlockSpec((bt, 1, th, ww), lambda i, j: (i, 0, j, 0)),
        compiler_params=pltpu.CompilerParams(
            dimension_semantics=("parallel", "parallel"),
            vmem_limit_bytes=vmem_limit),
        cost_estimate=pl.CostEstimate(
            flops=2 * n_out, transcendentals=n_out,
            bytes_accessed=2 * n_out * itemsize),
    )(w, b, x4)
    return out.reshape(bsz, ch, 1, hh, ww)


def test_model_forward(x: jax.Array, w: jax.Array, b: jax.Array,
                       return_sequences: bool = True) -> jax.Array:
    """JAX/Pallas port of TestModel.forward."""
    if return_sequences:
        return pallas_scaled_sigmoid(x, w, b)
    return pallas_scaled_sigmoid_last_depth(x, w, b)


if __name__ == "__main__":
    key = jax.random.PRNGKey(0)

    # Deterministic parameters: torch.ones(1) for both W and B.
    W = jnp.ones((1,), dtype=jnp.float32)
    B = jnp.ones((1,), dtype=jnp.float32)

    k1, k2, k3, k4 = jax.random.split(key, 4)

    # return_sequences=True path: 4D NCHW input.
    x4 = jax.random.normal(k1, (2, 4, 16, 16), dtype=jnp.float32)
    y4 = jax.block_until_ready(test_model_forward(x4, W, B, return_sequences=True))
    ref4 = jax.nn.sigmoid(x4 * W[0] + B[0])
    assert y4.shape == x4.shape
    assert jnp.allclose(y4, ref4, atol=1e-6, rtol=1e-6)

    # return_sequences=False path: 5D NCDHW input (depth slice folded into BlockSpec).
    x5 = jax.random.normal(k2, (2, 4, 8, 16, 16), dtype=jnp.float32)
    y5 = jax.block_until_ready(test_model_forward(x5, W, B, return_sequences=False))
    ref5 = jax.nn.sigmoid(x5[:, :, -1] * W[0] + B[0]).reshape(2, 4, 1, 16, 16)
    assert y5.shape == (2, 4, 1, 16, 16)
    assert jnp.allclose(y5, ref5, atol=1e-6, rtol=1e-6)

    # Ragged dims (nothing divisible by 8/128): exercises full-trailing-dim blocks.
    x4b = jax.random.normal(k3, (2, 3, 10, 20), dtype=jnp.float32)
    y4b = jax.block_until_ready(test_model_forward(x4b, W, B, return_sequences=True))
    assert jnp.allclose(y4b, jax.nn.sigmoid(x4b * W[0] + B[0]), atol=1e-6, rtol=1e-6)

    # Lane-dense bitcast path (last dim a multiple of 128).
    x4c = jax.random.normal(k4, (2, 4, 8, 128), dtype=jnp.float32)
    y4c = jax.block_until_ready(test_model_forward(x4c, W, B, return_sequences=True))
    assert jnp.allclose(y4c, jax.nn.sigmoid(x4c * W[0] + B[0]), atol=1e-6, rtol=1e-6)

    print("KERNEL_OK")
</pallas_src>

<mosaic_0001>
module attributes {stable_mosaic.version = 11 : i64} {
  func.func @_scaled_sigmoid_kernel(%arg0: i32, %arg1: i32, %arg2: memref<1xf32, #tpu.memory_space<smem>>, %arg3: memref<1xf32, #tpu.memory_space<smem>>, %arg4: memref<8x16x16xf32, #tpu.memory_space<vmem>>, %arg5: memref<8x16x16xf32, #tpu.memory_space<vmem>>) attributes {dimension_semantics = [#tpu.dimension_semantics<parallel>, #tpu.dimension_semantics<parallel>], iteration_bounds = array<i64: 1, 1>, scalar_prefetch = 0 : i64, scratch_operands = 0 : i64, tpu.core_type = #tpu.core_type<tc>, window_params = [{transform_indices = @transform_0, window_bounds = array<i64: 1>}, {transform_indices = @transform_1, window_bounds = array<i64: 1>}, {transform_indices = @transform_2, window_bounds = array<i64: 8, 16, 16>}, {transform_indices = @transform_3, window_bounds = array<i64: 8, 16, 16>}]} {
    %c0 = arith.constant 0 : index
    %c0_0 = arith.constant 0 : index
    %c0_1 = arith.constant 0 : index
    %0 = vector.load %arg4[%c0, %c0_0, %c0_1] : memref<8x16x16xf32, #tpu.memory_space<vmem>>, vector<8x16x16xf32>
    %c0_2 = arith.constant 0 : index
    %1 = memref.load %arg2[%c0_2] : memref<1xf32, #tpu.memory_space<smem>>
    %2 = vector.broadcast %1 : f32 to vector<8x16x16xf32>
    %3 = arith.mulf %0, %2 : vector<8x16x16xf32>
    %c0_3 = arith.constant 0 : index
    %4 = memref.load %arg3[%c0_3] : memref<1xf32, #tpu.memory_space<smem>>
    %5 = vector.broadcast %4 : f32 to vector<8x16x16xf32>
    %6 = arith.addf %3, %5 : vector<8x16x16xf32>
    %7 = arith.negf %6 : vector<8x16x16xf32>
    %8 = math.exp %7 : vector<8x16x16xf32>
    %cst = arith.constant 1.000000e+00 : f32
    %9 = vector.broadcast %cst : f32 to vector<8x16x16xf32>
    %10 = arith.addf %9, %8 : vector<8x16x16xf32>
    %11 = arith.divf %9, %10 : vector<8x16x16xf32>
    %c0_4 = arith.constant 0 : index
    %c0_5 = arith.constant 0 : index
    %c0_6 = arith.constant 0 : index
    %12 = vector.load %arg5[%c0_4, %c0_5, %c0_6] : memref<8x16x16xf32, #tpu.memory_space<vmem>>, vector<8x16x16xf32>
    tpu.vector_store %arg5[%c0_4, %c0_5, %c0_6], %11 {strides = array<i32>} : memref<8x16x16xf32, #tpu.memory_space<vmem>>, vector<8x16x16xf32>,
    return
  }
  func.func @transform_0(%arg0: i32, %arg1: i32) -> i32 {
    %c0_i32 = arith.constant 0 : i32
    %c0_i32_0 = arith.constant 0 : i32
    return %c0_i32 : i32
  }
  func.func @transform_1(%arg0: i32, %arg1: i32) -> i32 {
    %c0_i32 = arith.constant 0 : i32
    %c0_i32_0 = arith.constant 0 : i32
    return %c0_i32 : i32
  }
  func.func @transform_2(%arg0: i32, %arg1: i32) -> (i32, i32, i32) {
    %c0_i32 = arith.constant 0 : i32
    %c0_i32_0 = arith.constant 0 : i32
    return %arg0, %arg1, %c0_i32 : i32, i32, i32
  }
  func.func @transform_3(%arg0: i32, %arg1: i32) -> (i32, i32, i32) {
    %c0_i32 = arith.constant 0 : i32
    %c0_i32_0 = arith.constant 0 : i32
    return %arg0, %arg1, %c0_i32 : i32, i32, i32
  }
}

</mosaic_0001>

<bundles_post_ra>
// kernel: tpu_custom_call.1
= control target key start
LH: loop header
LB: loop body
LE: loop exit
PB: predicated region body
PF: predicated region fallthrough
CT: control target
= control target key end

     0   :  { %10 = vsyncpa [#allocation5], 0  ;;  %s457_s0 = inlined_call_operand.<no memory space> [shape: f32[1], index: 0, kind: input, shape index: {}]   ;;  %s458_s1 = inlined_call_operand.<no memory space> [shape: f32[1], index: 1, kind: input, shape index: {}]   ;;  %s459_s2 = inlined_call_operand.hbm [shape: f32[8,16,16], index: 2, kind: input, shape index: {}]   ;;  %s460_s3 = inlined_call_operand.hbm [shape: f32[8,16,16], index: 3, kind: output, shape index: {}]  }
   0x1   :  { %11 = vsyncpa [#allocation6], 0  ;;  %s345_s12 = smov [#allocation4]   ;;  %s297_s16 = scalar_lea.hbm %s459_s2, 2048 }
   0x2   :  { %s21_s13 = sshll.u32 %s345_s12, 4  ;;  %p298_p0 = scmp.ne.s32.totalorder %s459_s2, %s297_s16  ;;  %s22_s13 = int_to_ptr.vmem [resolvable:$true] %s21_s13 }
   0x3   :  { %p301_p1 = scmp.lt.u32.totalorder %s297_s16, %s459_s2 }
   0x5   :  { %p303_p2 = pnand %p301_p1, %p298_p0 }
   0x7   :  { %306 = shalt.err (!%p303_p2)
}
   0x8   :  { %s307_s21 = scalar_lea.vmem %s22_s13, 2048  ;;  %p312_p4 = scmp.lt.s32.totalorder %s22_s13, %s22_s13 }
   0x9   :  { %p308_p3 = scmp.ne.s32.totalorder %s22_s13, %s307_s21  ;;  %p313_p5 = scmp.lt.s32.totalorder %s307_s21, %s307_s21 }
   0xb   :  { %p314_p6 = por %p313_p5, %p312_p4 }
   0xd   :  { %p315_p7 = pnand %p314_p6, %p308_p3 }
   0xf   :  { %318 = shalt.err (!%p315_p7)
}
  0x10   :  { %s346_s22 = smov 128   ;;  %s347_s23 = smov 8  }
  0x11   :  { %27 = dma.hbm_to_vmem [thread:$0]  %s459_s2, 2048, %s22_s13, [#allocation5], %s346_s22, %s346_s22, %s347_s23  }
  0x12   :  { %341 = dma.done.wait [#allocation5], 2048  }
  0x13   :  { %342 = vsyncadd [#allocation5], 4294965248  ;;  %v387_v0 = vstv %s457_s0  ;;  %v31_v1 = vld [vmem:[#allocation4] sm:$0xff]  ;;  %v392_v2 = vstv %s458_s1  ;;  %v32_v3 = vld [vmem:[#allocation4 + $0x8] sm:$0xff]  ;;  %vm179_vm0 = vcmask 130048   ;;  %s348_s0 = smov [#allocation7]  }
  0x14   :  { %v33_v4 = vld [vmem:[#allocation4 + $0x10] sm:$0xff]  ;;  %v49_v5 = vmul.f32 %v387_v0, %v31_v1  ;;  %v50_v6 = vmul.f32 %v387_v0, %v32_v3  ;;  %v34_v8 = vld [vmem:[#allocation4 + $0x18] sm:$0xff]  ;;  %v35_v9 = vld [vmem:[#allocation4 + $0x20] sm:$0xff]  ;;  %s201_s1 = sshll.u32 %s348_s0, 4  ;;  %s202_s1 = int_to_ptr.vmem [resolvable:$true] %s201_s1 }
  0x15   :  { %v51_v7 = vmul.f32 %v387_v0, %v33_v4  ;;  %v36_v10 = vld [vmem:[#allocation4 + $0x28] sm:$0xff]  ;;  %v52_v11 = vmul.f32 %v387_v0, %v34_v8  ;;  %v53_v12 = vmul.f32 %v387_v0, %v35_v9  ;;  %v37_v14 = vld [vmem:[#allocation4 + $0x30] sm:$0xff]  ;;  %v38_v15 = vld [vmem:[#allocation4 + $0x38] sm:$0xff]  ;;  %s319_s2 = scalar_lea.vmem %s202_s1, 2048  ;;  %p324_p9 = scmp.lt.s32.totalorder %s202_s1, %s202_s1 }
  0x16   :  { %v54_v13 = vmul.f32 %v387_v0, %v36_v10  ;;  %v67_v16 = vadd.f32 %v392_v2, %v49_v5  ;;  %v68_v17 = vadd.f32 %v392_v2, %v50_v6  ;;  %v55_v19 = vmul.f32 %v387_v0, %v37_v14  ;;  %v39_v20 = vld [vmem:[#allocation4 + $0x40] sm:$0xff]  ;;  %v40_v25 = vld [vmem:[#allocation4 + $0x48] sm:$0xff]  ;;  %v41_v26 = vld [vmem:[#allocation4 + $0x50] sm:$0xff]  ;;  %p320_p8 = scmp.ne.s32.totalorder %s202_s1, %s319_s2  ;;  %p325_p10 = scmp.lt.s32.totalorder %s319_s2, %s319_s2 }
  0x17   :  { %v69_v18 = vadd.f32 %v392_v2, %v51_v7  ;;  %v70_v21 = vadd.f32 %v392_v2, %v52_v11  ;;  %v71_v22 = vadd.f32 %v392_v2, %v53_v12  ;;  %v56_v24 = vmul.f32 %v387_v0, %v38_v15  ;;  %v42_v27 = vld [vmem:[#allocation4 + $0x58] sm:$0xff]  ;;  %v43_v35 = vld [vmem:[#allocation4 + $0x60] sm:$0xff]  ;;  %v44_v57 = vld [vmem:[#allocation4 + $0x68] sm:$0xff] }
  0x18   :  { %v72_v23 = vadd.f32 %v392_v2, %v54_v13  ;;  %v213_v28 = vmul.f32 -1.442695, %v67_v16  ;;  %v214_v29 = vmul.f32 -1.442695, %v68_v17  ;;  %v73_v31 = vadd.f32 %v392_v2, %v55_v19  ;;  %v45_v60 = vld [vmem:[#allocation4 + $0x70] sm:$0xff]  ;;  %v46_v63 = vld [vmem:[#allocation4 + $0x78] sm:$0xff]  ;;  %p326_p11 = por %p325_p10, %p324_p9 }
  0x19   :  { %v215_v30 = vmul.f32 -1.442695, %v69_v18  ;;  %v216_v32 = vmul.f32 -1.442695, %v70_v21  ;;  %v217_v33 = vmul.f32 -1.442695, %v71_v22  ;;  %v74_v34 = vadd.f32 %v392_v2, %v56_v24 }
  0x1a   :  { %233 = vpow2.f32 %v213_v28  ;;  %v218_v36 = vmul.f32 -1.442695, %v72_v23  ;;  %v57_v37 = vmul.f32 %v387_v0, %v39_v20  ;;  %v58_v38 = vmul.f32 %v387_v0, %v40_v25  ;;  %p327_p12 = pnand %p326_p11, %p320_p8 }
  0x1b   :  { %235 = vpow2.f32 %v214_v29  ;;  %v219_v39 = vmul.f32 -1.442695, %v73_v31  ;;  %v59_v40 = vmul.f32 %v387_v0, %v41_v26  ;;  %v60_v41 = vmul.f32 %v387_v0, %v42_v27 }
  0x1c   :  { %237 = vpow2.f32 %v215_v30  ;;  %v75_v42 = vadd.f32 %v392_v2, %v57_v37  ;;  %v76_v43 = vadd.f32 %v392_v2, %v58_v38  ;;  %v61_v44 = vmul.f32 %v387_v0, %v43_v35 }
  0x1d   :  { %239 = vpow2.f32 %v216_v32  ;;  %v220_v45 = vmul.f32 -1.442695, %v74_v34  ;;  %v77_v46 = vadd.f32 %v392_v2, %v59_v40  ;;  %v78_v47 = vadd.f32 %v392_v2, %v60_v41 }
  0x1e   :  { %241 = vpow2.f32 %v217_v33  ;;  %v221_v48 = vmul.f32 -1.442695, %v75_v42  ;;  %v79_v49 = vadd.f32 %v392_v2, %v61_v44  ;;  %v222_v50 = vmul.f32 -1.442695, %v76_v43 }
  0x1f   :  { %243 = vpow2.f32 %v218_v36  ;;  %v223_v51 = vmul.f32 -1.442695, %v77_v46  ;;  %v224_v52 = vmul.f32 -1.442695, %v78_v47  ;;  %v62_v4 = vmul.f32 %v387_v0, %v44_v57 }
  0x20   :  { %245 = vpow2.f32 %v219_v39  ;;  %v225_v53 = vmul.f32 -1.442695, %v79_v49  ;;  %v63_v7 = vmul.f32 %v387_v0, %v45_v60  ;;  %v64_v10 = vmul.f32 %v387_v0, %v46_v63 }
  0x21   :  { %247 = vpow2.f32 %v220_v45  ;;  %v80_v15 = vadd.f32 %v392_v2, %v62_v4 }
  0x22   :  { %249 = vpow2.f32 %v221_v48  ;;  %v81_v18 = vadd.f32 %v392_v2, %v63_v7  ;;  %v82_v21 = vadd.f32 %v392_v2, %v64_v10 }
  0x23   :  { %251 = vpow2.f32 %v222_v50  ;;  %v226_v25 = vmul.f32 -1.442695, %v80_v15 }
  0x24   :  { %v234_v54 = vpop.eup %233  ;;  %253 = vpow2.f32 %v223_v51  ;;  %v227_v28 = vmul.f32 -1.442695, %v81_v18  ;;  %v228_v30 = vmul.f32 -1.442695, %v82_v21 }
  0x25   :  { %v236_v55 = vpop.eup %235  ;;  %v131_v56 = vadd.f32 1.0, %v234_v54  ;;  %255 = vpow2.f32 %v224_v52 }
  0x26   :  { %v238_v58 = vpop.eup %237  ;;  %v132_v59 = vadd.f32 1.0, %v236_v55  ;;  %257 = vpow2.f32 %v225_v53 }
  0x27   :  { %v240_v61 = vpop.eup %239  ;;  %259 = vrcp.f32 %v131_v56  ;;  %v133_v62 = vadd.f32 1.0, %v238_v58 }
  0x28   :  { %v242_v1 = vpop.eup %241  ;;  %261 = vrcp.f32 %v132_v59  ;;  %v134_v3 = vadd.f32 1.0, %v240_v61 }
  0x29   :  { %v244_v5 = vpop.eup %243  ;;  %263 = vrcp.f32 %v133_v62  ;;  %v135_v6 = vadd.f32 1.0, %v242_v1 }
  0x2a   :  { %v246_v8 = vpop.eup %245  ;;  %265 = vrcp.f32 %v134_v3  ;;  %v136_v9 = vadd.f32 1.0, %v244_v5 }
  0x2b   :  { %v248_v11 = vpop.eup %247  ;;  %267 = vrcp.f32 %v135_v6  ;;  %v137_v12 = vadd.f32 1.0, %v246_v8 }
  0x2c   :  { %v250_v13 = vpop.eup %249  ;;  %269 = vrcp.f32 %v136_v9  ;;  %v138_v14 = vadd.f32 1.0, %v248_v11 }
  0x2d   :  { %v252_v16 = vpop.eup %251  ;;  %271 = vrcp.f32 %v137_v12  ;;  %v139_v17 = vadd.f32 1.0, %v250_v13 }
  0x2e   :  { %v254_v19 = vpop.eup %253  ;;  %273 = vrcp.f32 %v138_v14  ;;  %v140_v20 = vadd.f32 1.0, %v252_v16 }
  0x2f   :  { %v256_v22 = vpop.eup %255  ;;  %275 = vrcp.f32 %v139_v17  ;;  %v141_v0 = vadd.f32 1.0, %v254_v19 }
  0x30   :  { %v258_v23 = vpop.eup %257  ;;  %277 = vrcp.f32 %v140_v20  ;;  %v142_v24 = vadd.f32 1.0, %v256_v22 }
  0x31   :  { %v260_v26 = vpop.eup %259  ;;  %279 = vrcp.f32 %v141_v0  ;;  %v143_v27 = vadd.f32 1.0, %v258_v23 }
  0x32   :  { %v262_v29 = vpop.eup %261  ;;  %180 = vst.msk [vmem:[#allocation7] sm:$0xff] %vm179_vm0, %v260_v26  ;;  %281 = vrcp.f32 %v142_v24 }
  0x33   :  { %v264_v31 = vpop.eup %263  ;;  %181 = vst.msk [vmem:[#allocation7 + $0x8] sm:$0xff] %vm179_vm0, %v262_v29  ;;  %283 = vrcp.f32 %v143_v27 }
  0x34   :  { %v266_v2 = vpop.eup %265  ;;  %182 = vst.msk [vmem:[#allocation7 + $0x10] sm:$0xff] %vm179_vm0, %v264_v31  ;;  %285 = vpow2.f32 %v226_v25 }
  0x35   :  { %v268_v32 = vpop.eup %267  ;;  %183 = vst.msk [vmem:[#allocation7 + $0x18] sm:$0xff] %vm179_vm0, %v266_v2  ;;  %287 = vpow2.f32 %v227_v28 }
  0x36   :  { %v270_v33 = vpop.eup %269  ;;  %184 = vst.msk [vmem:[#allocation7 + $0x20] sm:$0xff] %vm179_vm0, %v268_v32  ;;  %289 = vpow2.f32 %v228_v30 }
  0x37   :  { %v272_v34 = vpop.eup %271  ;;  %185 = vst.msk [vmem:[#allocation7 + $0x28] sm:$0xff] %vm179_vm0, %v270_v33 }
  0x38   :  { %v274_v35 = vpop.eup %273  ;;  %186 = vst.msk [vmem:[#allocation7 + $0x30] sm:$0xff] %vm179_vm0, %v272_v34 }
  0x39   :  { %v276_v36 = vpop.eup %275  ;;  %187 = vst.msk [vmem:[#allocation7 + $0x38] sm:$0xff] %vm179_vm0, %v274_v35 }
  0x3a   :  { %v278_v37 = vpop.eup %277  ;;  %188 = vst.msk [vmem:[#allocation7 + $0x40] sm:$0xff] %vm179_vm0, %v276_v36 }
  0x3b   :  { %v280_v38 = vpop.eup %279  ;;  %189 = vst.msk [vmem:[#allocation7 + $0x48] sm:$0xff] %vm179_vm0, %v278_v37 }
  0x3c   :  { %v282_v39 = vpop.eup %281  ;;  %190 = vst.msk [vmem:[#allocation7 + $0x50] sm:$0xff] %vm179_vm0, %v280_v38 }
  0x3d   :  { %v284_v40 = vpop.eup %283  ;;  %191 = vst.msk [vmem:[#allocation7 + $0x58] sm:$0xff] %vm179_vm0, %v282_v39 }
  0x3e   :  { %v286_v41 = vpop.eup %285  ;;  %192 = vst.msk [vmem:[#allocation7 + $0x60] sm:$0xff] %vm179_vm0, %v284_v40 }
  0x3f   :  { %v288_v42 = vpop.eup %287  ;;  %v144_v43 = vadd.f32 1.0, %v286_v41 }
  0x40   :  { %v290_v44 = vpop.eup %289  ;;  %v145_v45 = vadd.f32 1.0, %v288_v42 }
  0x41   :  { %291 = vrcp.f32 %v144_v43  ;;  %v146_v46 = vadd.f32 1.0, %v290_v44 }
  0x42   :  { %293 = vrcp.f32 %v145_v45 }
  0x43   :  { %295 = vrcp.f32 %v146_v46 }
  0x4b   :  { %v292_v47 = vpop.eup %291 }
  0x4c   :  { %v294_v48 = vpop.eup %293  ;;  %193 = vst.msk [vmem:[#allocation7 + $0x68] sm:$0xff] %vm179_vm0, %v292_v47 }
  0x4d   :  { %v296_v49 = vpop.eup %295  ;;  %194 = vst.msk [vmem:[#allocation7 + $0x70] sm:$0xff] %vm179_vm0, %v294_v48 }
  0x4e   :  { %195 = vst.msk [vmem:[#allocation7 + $0x78] sm:$0xff] %vm179_vm0, %v296_v49 }
  0x4f   :  { %330 = shalt.err (!%p327_p12)
}
  0x50   :  { %s331_s5 = scalar_lea.hbm %s460_s3, 2048 }
  0x51   :  { %p332_p13 = scmp.ne.s32.totalorder %s460_s3, %s331_s5  ;;  %p335_p0 = scmp.lt.u32.totalorder %s331_s5, %s460_s3 }
  0x53   :  { %p337_p1 = pnand %p335_p0, %p332_p13 }
  0x55   :  { %340 = shalt.err (!%p337_p1)
}
  0x56   :  { %207 = dma.vmem_to_hbm [thread:$0]  %s202_s1, 2048, %s460_s3, [#allocation6], %s346_s22, %s346_s22, %s347_s23  }
  0x57   :  { %343 = dma.done.wait [#allocation6], 2048  }
  0x58   :  { %344 = vsyncadd [#allocation6], 4294965248 }
  0x59   :  { %211 = vsyncpa [#allocation5], 1 }
  0x5a   :  { %212 = vsyncpa [#allocation6], 1 }

</bundles_post_ra>
